<compile_context>
chip_gen: v5e
topology: v5e:2x2
jax: 0.10.0
libtpu: 0.0.40
codegen_flags: <defaults>
</compile_context>

<pallas_src>
import jax
import jax.numpy as jnp
from jax.experimental import pallas as pl
from jax.experimental.pallas import tpu as pltpu

_LANE = 128


def _softplus(x):
    # Numerically stable softplus (same formula as the pure-JAX reference).
    return jnp.maximum(x, 0.0) + jnp.log(1.0 + jnp.exp(-jnp.abs(x)))


def _make_modelf_kernel(n_hidden, state_dim):
    """Fused ModelF forward kernel, feature-major (batch on the lane axis)."""

    def kernel(*refs):
        # refs = [x_t, (W, b) * n_hidden, W_head, b_head, out]
        x_ref = refs[0]
        idx = 1

        x = x_ref[...].astype(jnp.float32)            # (S, block_b)
        h = x
        for _ in range(n_hidden):
            w_ref, b_ref = refs[idx], refs[idx + 1]
            idx += 2
            h = jnp.dot(w_ref[...], h, preferred_element_type=jnp.float32)
            h = h + b_ref[...]                        # (d, 1) lane-broadcast
            h = jnp.maximum(h, 0.01 * h)              # leaky_relu, slope 0.01

        w_head_ref, b_head_ref = refs[idx], refs[idx + 1]
        out_ref = refs[idx + 2]

        # Fused mu|sigma head: single (2S, d_h) @ (d_h, block_b) matmul.
        head = jnp.dot(w_head_ref[...], h, preferred_element_type=jnp.float32)
        head = head + b_head_ref[...]                 # (2S, block_b)
        mu = head[:state_dim, :]
        sg = head[state_dim:, :]

        m = jnp.clip(x + 0.01 * mu, -2.0, 2.0)
        s = jnp.clip(_softplus(sg), 1e-10, 1.0)

        out_ref[:state_dim, :] = m.astype(out_ref.dtype)
        out_ref[state_dim:, :] = s.astype(out_ref.dtype)

    return kernel


def _pick_block_b(b_pad, state_dim, *, target_payload=1 << 20, vmem_budget=12 << 20):
    """Largest lane-multiple block that divides b_pad, sized against VMEM/roofline.

    Payload per batch row (f32): x block (S) + fused m|s output block (2S).
    Double-buffered payload must stay under `vmem_budget` (sized against the
    smallest scoped-VMEM generation, with headroom); aim for ~1 MiB/step, and
    keep >= 2 grid steps when possible so v7x can use both TensorCores.
    """
    per_row = 3 * state_dim * 4
    cap = min(vmem_budget // (2 * per_row),
              max(_LANE, target_payload // per_row),
              b_pad)
    if b_pad >= 2 * _LANE:
        cap = min(cap, b_pad // 2)          # >= 2 grid steps (v7x megacore)
    best = _LANE
    c = _LANE
    while c <= cap:
        if b_pad % c == 0:
            best = c
        c += _LANE
    return best


def modelf_forward(current_state, hidden_layers, mu_layer, sigma_layer, *, block_b=None):
    """ModelF forward (discrete_state=False path).

    current_state: (B, S) f32
    hidden_layers: list of (W, b) with W: (d_out, d_in)  [torch nn.Linear layout], b: (d_out,)
    mu_layer / sigma_layer: (W, b) with W: (S, d_h), b: (S,)
    Returns (m, s): the loc / scale of the Normal distribution, shape (B, S).
    """
    B, S = current_state.shape
    n_hidden = len(hidden_layers)

    # Lane-dense layout: batch on the lane axis, padded to a multiple of 128.
    b_pad = max(_LANE, -(-B // _LANE) * _LANE)
    x_t = jnp.pad(current_state.T, ((0, 0), (0, b_pad - B)))   # (S, b_pad)

    if block_b is None:
        block_b = _pick_block_b(b_pad, S)
    assert b_pad % block_b == 0 and block_b % _LANE == 0
    grid = (b_pad // block_b,)

    # Fuse mu/sigma heads: one (2S, d_h) weight, one (2S, 1) bias.
    (w_mu, b_mu), (w_sg, b_sg) = mu_layer, sigma_layer
    w_head = jnp.concatenate([w_mu, w_sg], axis=0)
    b_head = jnp.concatenate([b_mu, b_sg], axis=0).reshape(2 * S, 1)

    inputs = [x_t]
    in_specs = [pl.BlockSpec((S, block_b), lambda i: (0, i))]
    for w, b in hidden_layers:
        d_out, d_in = w.shape
        inputs += [w, b.reshape(d_out, 1)]
        # Weights/biases: constant index_map -> tiny, stay resident in VMEM.
        in_specs.append(pl.BlockSpec((d_out, d_in), lambda i: (0, 0)))
        in_specs.append(pl.BlockSpec((d_out, 1), lambda i: (0, 0)))
    inputs += [w_head, b_head]
    in_specs.append(pl.BlockSpec((2 * S, w_head.shape[1]), lambda i: (0, 0)))
    in_specs.append(pl.BlockSpec((2 * S, 1), lambda i: (0, 0)))

    # Single dense output: rows [0:S] = m, rows [S:2S] = s.
    out_shape = jax.ShapeDtypeStruct((2 * S, b_pad), current_state.dtype)
    out_specs = pl.BlockSpec((2 * S, block_b), lambda i: (0, i))

    # Advisory cost estimate for XLA scheduling around this bandwidth-bound call.
    flops = sum(2 * b_pad * w.shape[0] * w.shape[1] for w, _ in hidden_layers)
    flops += 2 * b_pad * w_head.shape[0] * w_head.shape[1]
    param_bytes = sum(w.size * 4 + b.size * 4 for w, b in hidden_layers)
    param_bytes += (w_head.size + b_head.size) * 4
    bytes_accessed = 4 * b_pad * S * 3 + param_bytes       # x in, m|s out, params
    cost = pl.CostEstimate(flops=flops, transcendentals=b_pad * S,
                           bytes_accessed=bytes_accessed)

    out = pl.pallas_call(
        _make_modelf_kernel(n_hidden, S),
        out_shape=out_shape,
        grid=grid,
        in_specs=in_specs,
        out_specs=out_specs,
        compiler_params=pltpu.CompilerParams(
            dimension_semantics=("parallel",),
            vmem_limit_bytes=32 * 1024 * 1024),
        cost_estimate=cost,
    )(*inputs)

    # Split the fused block and drop batch padding; callers that can consume
    # the feature-major layout directly may skip these transposes.
    m = out[:S, :B].T
    s = out[S:, :B].T
    return m, s


def _ref_forward(current_state, hidden_layers, mu_layer, sigma_layer):
    """Pure-JAX reference of ModelF.forward (discrete_state=False)."""
    x = current_state
    for w, b in hidden_layers:          # w in torch (out, in) layout
        x = x @ w.T + b
        x = jnp.where(x > 0, x, 0.01 * x)
    w_mu, b_mu = mu_layer
    w_sg, b_sg = sigma_layer
    m = jnp.clip(current_state + 0.01 * (x @ w_mu.T + b_mu), -2.0, 2.0)
    s = jnp.clip(_softplus(x @ w_sg.T + b_sg), 1e-10, 1.0)
    return m, s


def _kaiming(key, d_out, d_in):
    # kaiming_normal_ (leaky_relu): std = sqrt(2 / (1 + 0.01^2)) / sqrt(fan_in)
    std = (2.0 / (1.0 + 0.01 ** 2)) ** 0.5 / (d_in ** 0.5)
    return std * jax.random.normal(key, (d_out, d_in), jnp.float32)


if __name__ == "__main__":
    key = jax.random.PRNGKey(0)
    B, STATE_DIM, INPUT_DIM = 256, 8, 4
    H_DIM = [16]

    keys = jax.random.split(key, 12)
    current_state = jax.random.normal(keys[0], (B, STATE_DIM), jnp.float32)
    # input_ is unpacked but never used by ModelF.forward in the torch source.
    input_ = jax.random.normal(keys[1], (B, INPUT_DIM), jnp.float32)

    # Parameters in torch nn.Linear layout: W (out_features, in_features).
    hidden_layers = []
    prev_d, kidx = STATE_DIM, 2
    for d in H_DIM:
        w = _kaiming(keys[kidx], d, prev_d)
        b = 0.01 * jax.random.normal(keys[kidx + 1], (d,), jnp.float32)
        hidden_layers.append((w, b))
        prev_d, kidx = d, kidx + 2
    mu_layer = (_kaiming(keys[kidx], STATE_DIM, prev_d),
                0.01 * jax.random.normal(keys[kidx + 1], (STATE_DIM,), jnp.float32))
    sigma_layer = (_kaiming(keys[kidx + 2], STATE_DIM, prev_d),
                   0.01 * jax.random.normal(keys[kidx + 3], (STATE_DIM,), jnp.float32))

    m, s = modelf_forward(current_state, hidden_layers, mu_layer, sigma_layer)
    m, s = jax.block_until_ready((m, s))

    m_ref, s_ref = _ref_forward(current_state, hidden_layers, mu_layer, sigma_layer)

    assert m.shape == (B, STATE_DIM) and s.shape == (B, STATE_DIM)
    assert jnp.allclose(m, m_ref, atol=1e-5, rtol=1e-5)
    assert jnp.allclose(s, s_ref, atol=1e-5, rtol=1e-5)
    # TODO(synk): discrete_state=True branch (RelaxedOneHotCategorical sampling) not implemented.
    print("KERNEL_OK")
</pallas_src>

<mosaic_0001>
module attributes {stable_mosaic.version = 11 : i64} {
  func.func @kernel(%arg0: i32, %arg1: memref<8x128xf32, #tpu.memory_space<vmem>>, %arg2: memref<16x8xf32, #tpu.memory_space<vmem>>, %arg3: memref<16x1xf32, #tpu.memory_space<vmem>>, %arg4: memref<16x16xf32, #tpu.memory_space<vmem>>, %arg5: memref<16x1xf32, #tpu.memory_space<vmem>>, %arg6: memref<16x128xf32, #tpu.memory_space<vmem>>) attributes {dimension_semantics = [#tpu.dimension_semantics<parallel>], iteration_bounds = array<i64: 2>, scalar_prefetch = 0 : i64, scratch_operands = 0 : i64, tpu.core_type = #tpu.core_type<tc>, window_params = [{transform_indices = @transform_0, window_bounds = array<i64: 8, 128>}, {pipeline_mode = #tpu.pipeline_mode<synchronous>, transform_indices = @transform_1, window_bounds = array<i64: 16, 8>}, {pipeline_mode = #tpu.pipeline_mode<synchronous>, transform_indices = @transform_2, window_bounds = array<i64: 16, 1>}, {pipeline_mode = #tpu.pipeline_mode<synchronous>, transform_indices = @transform_3, window_bounds = array<i64: 16, 16>}, {pipeline_mode = #tpu.pipeline_mode<synchronous>, transform_indices = @transform_4, window_bounds = array<i64: 16, 1>}, {transform_indices = @transform_5, window_bounds = array<i64: 16, 128>}]} {
    %c0 = arith.constant 0 : index
    %c0_0 = arith.constant 0 : index
    %0 = vector.load %arg1[%c0, %c0_0] : memref<8x128xf32, #tpu.memory_space<vmem>>, vector<8x128xf32>
    %c0_1 = arith.constant 0 : index
    %c0_2 = arith.constant 0 : index
    %1 = vector.load %arg2[%c0_1, %c0_2] : memref<16x8xf32, #tpu.memory_space<vmem>>, vector<16x8xf32>
    %cst = arith.constant dense<0.000000e+00> : vector<16x128xf32>
    %2 = tpu.matmul %1, %0, %cst {dimension_numbers = #tpu.dot_dimension_numbers<[1], [0], [0], [1], [0, 0, 1, 1], [], []>} : vector<16x8xf32>, vector<8x128xf32>, vector<16x128xf32> -> vector<16x128xf32>
    %c0_3 = arith.constant 0 : index
    %c0_4 = arith.constant 0 : index
    %3 = vector.load %arg3[%c0_3, %c0_4] : memref<16x1xf32, #tpu.memory_space<vmem>>, vector<16x1xf32>
    %4 = vector.broadcast %3 : vector<16x1xf32> to vector<16x128xf32>
    %5 = arith.addf %2, %4 : vector<16x128xf32>
    %cst_5 = arith.constant 0.00999999977 : f32
    %6 = vector.broadcast %cst_5 : f32 to vector<16x128xf32>
    %7 = arith.mulf %6, %5 : vector<16x128xf32>
    %8 = arith.maximumf %5, %7 : vector<16x128xf32>
    %c0_6 = arith.constant 0 : index
    %c0_7 = arith.constant 0 : index
    %9 = vector.load %arg4[%c0_6, %c0_7] : memref<16x16xf32, #tpu.memory_space<vmem>>, vector<16x16xf32>
    %cst_8 = arith.constant dense<0.000000e+00> : vector<16x128xf32>
    %10 = tpu.matmul %9, %8, %cst_8 {dimension_numbers = #tpu.dot_dimension_numbers<[1], [0], [0], [1], [0, 0, 1, 1], [], []>} : vector<16x16xf32>, vector<16x128xf32>, vector<16x128xf32> -> vector<16x128xf32>
    %c0_9 = arith.constant 0 : index
    %c0_10 = arith.constant 0 : index
    %11 = vector.load %arg5[%c0_9, %c0_10] : memref<16x1xf32, #tpu.memory_space<vmem>>, vector<16x1xf32>
    %12 = vector.broadcast %11 : vector<16x1xf32> to vector<16x128xf32>
    %13 = arith.addf %10, %12 : vector<16x128xf32>
    %14 = vector.extract_strided_slice %13 {offsets = [0, 0], sizes = [8, 128], strides = [1, 1]} : vector<16x128xf32> to vector<8x128xf32>
    %15 = vector.extract_strided_slice %13 {offsets = [8, 0], sizes = [8, 128], strides = [1, 1]} : vector<16x128xf32> to vector<8x128xf32>
    %cst_11 = arith.constant 0.00999999977 : f32
    %16 = vector.broadcast %cst_11 : f32 to vector<8x128xf32>
    %17 = arith.mulf %16, %14 : vector<8x128xf32>
    %18 = arith.addf %0, %17 : vector<8x128xf32>
    %cst_12 = arith.constant -2.000000e+00 : f32
    %cst_13 = arith.constant 2.000000e+00 : f32
    %19 = vector.broadcast %cst_12 : f32 to vector<8x128xf32>
    %20 = arith.maximumf %19, %18 : vector<8x128xf32>
    %21 = vector.broadcast %cst_13 : f32 to vector<8x128xf32>
    %22 = arith.minimumf %21, %20 : vector<8x128xf32>
    %cst_14 = arith.constant 0.000000e+00 : f32
    %23 = vector.broadcast %cst_14 : f32 to vector<8x128xf32>
    %24 = arith.maximumf %15, %23 : vector<8x128xf32>
    %25 = math.absf %15 : vector<8x128xf32>
    %cst_15 = arith.constant 0.000000e+00 : f32
    %26 = vector.broadcast %cst_15 : f32 to vector<8x128xf32>
    %27 = arith.subf %26, %25 : vector<8x128xf32>
    %28 = math.exp %27 : vector<8x128xf32>
    %cst_16 = arith.constant 1.000000e+00 : f32
    %29 = vector.broadcast %cst_16 : f32 to vector<8x128xf32>
    %30 = arith.addf %29, %28 : vector<8x128xf32>
    %31 = math.log %30 : vector<8x128xf32>
    %32 = arith.addf %24, %31 : vector<8x128xf32>
    %cst_17 = arith.constant 1.000000e-10 : f32
    %cst_18 = arith.constant 1.000000e+00 : f32
    %33 = vector.broadcast %cst_17 : f32 to vector<8x128xf32>
    %34 = arith.maximumf %33, %32 : vector<8x128xf32>
    %35 = vector.broadcast %cst_18 : f32 to vector<8x128xf32>
    %36 = arith.minimumf %35, %34 : vector<8x128xf32>
    %c0_19 = arith.constant 0 : index
    %c0_20 = arith.constant 0 : index
    %37 = vector.load %arg6[%c0_19, %c0_20] : memref<16x128xf32, #tpu.memory_space<vmem>>, vector<8x128xf32>
    tpu.vector_store %arg6[%c0_19, %c0_20], %22 {strides = array<i32>} : memref<16x128xf32, #tpu.memory_space<vmem>>, vector<8x128xf32>,
    %c8 = arith.constant 8 : index
    %c0_21 = arith.constant 0 : index
    %38 = vector.load %arg6[%c8, %c0_21] : memref<16x128xf32, #tpu.memory_space<vmem>>, vector<8x128xf32>
    tpu.vector_store %arg6[%c8, %c0_21], %36 {strides = array<i32>} : memref<16x128xf32, #tpu.memory_space<vmem>>, vector<8x128xf32>,
    return
  }
  func.func @transform_0(%arg0: i32) -> (i32, i32) {
    %c0_i32 = arith.constant 0 : i32
    %c0_i32_0 = arith.constant 0 : i32
    return %c0_i32, %arg0 : i32, i32
  }
  func.func @transform_1(%arg0: i32) -> (i32, i32) {
    %c0_i32 = arith.constant 0 : i32
    %c0_i32_0 = arith.constant 0 : i32
    %c0_i32_1 = arith.constant 0 : i32
    return %c0_i32, %c0_i32_0 : i32, i32
  }
  func.func @transform_2(%arg0: i32) -> (i32, i32) {
    %c0_i32 = arith.constant 0 : i32
    %c0_i32_0 = arith.constant 0 : i32
    %c0_i32_1 = arith.constant 0 : i32
    return %c0_i32, %c0_i32_0 : i32, i32
  }
  func.func @transform_3(%arg0: i32) -> (i32, i32) {
    %c0_i32 = arith.constant 0 : i32
    %c0_i32_0 = arith.constant 0 : i32
    %c0_i32_1 = arith.constant 0 : i32
    return %c0_i32, %c0_i32_0 : i32, i32
  }
  func.func @transform_4(%arg0: i32) -> (i32, i32) {
    %c0_i32 = arith.constant 0 : i32
    %c0_i32_0 = arith.constant 0 : i32
    %c0_i32_1 = arith.constant 0 : i32
    return %c0_i32, %c0_i32_0 : i32, i32
  }
  func.func @transform_5(%arg0: i32) -> (i32, i32) {
    %c0_i32 = arith.constant 0 : i32
    %c0_i32_0 = arith.constant 0 : i32
    return %c0_i32, %arg0 : i32, i32
  }
}

</mosaic_0001>

<bundles_post_ra>
// kernel: tpu_custom_call.1
= control target key start
LH: loop header
LB: loop body
LE: loop exit
PB: predicated region body
PF: predicated region fallthrough
CT: control target
= control target key end

     0   :  { %10 = vsyncpa [#allocation3], 0  ;;  %s685_s0 = inlined_call_operand.vmem [shape: f32[8,256], index: 0, kind: input, shape index: {}]   ;;  %s686_s1 = inlined_call_operand.vmem [shape: f32[16,8], index: 1, kind: input, shape index: {}]   ;;  %s687_s2 = inlined_call_operand.vmem [shape: f32[16,1], index: 2, kind: input, shape index: {}]   ;;  %s688_s3 = inlined_call_operand.vmem [shape: f32[16,16], index: 3, kind: input, shape index: {}]   ;;  %s689_s4 = inlined_call_operand.vmem [shape: f32[16,1], index: 4, kind: input, shape index: {}]   ;;  %s690_s5 = inlined_call_operand.hbm [shape: f32[16,256], index: 5, kind: output, shape index: {}]  }
   0x1   :  { %12 = vsyncpa [#allocation3 + $0x1], 0  ;;  %s572_s18 = smov 0   ;;  %s574_s19 = smov 0  }
   0x2   :  { %s576_s20 = smov 0   ;;  %s578_s21 = smov 0  }
   0x3 LB: > { %s593_s22 = sadd.s32 4294967295, %s536_s21   ;;  %s407_s23 = sadd.s32 4294967294, %s536_s21   ;;  %s536_s21 = sphi %s578_s21, %s696_s21   ;;  %s532_s20 = sphi %s576_s20, %s695_s20   ;;  %s528_s19 = sphi %s574_s19, %s694_s19   ;;  %s524_s18 = sphi %s572_s18, %s693_s18  }
   0x4   : > { %s597_s24 = sadd.s32 1, %s536_s21   ;;  %s135_s25 = sadd.s32 1, %s532_s20 }
   0x5   : > { %s132_s26 = ssub.s32 %s536_s21, %s597_s24  ;;  %p145_p0 = scmp.ne.s32.totalorder %s532_s20, %s528_s19 }
   0x6   : > { %p133_p1 = scmp.eq.s32.totalorder %s132_s26, 0  ;;  %p146_p2 = scmp.eq.s32.totalorder %s593_s22, 1 }
   0x7   : > { %p151_p3 = scmp.ne.s32.totalorder %s528_s19, %s524_s18  ;;  %p152_p4 = scmp.eq.s32.totalorder %s407_s23, 1 }
   0x8   : > { %s608_s27 = scalar_select %p133_p1, %s532_s20, %s135_s25  }
   0x9   : > { %p610_p5 = por %p146_p2, %p145_p0  ;;  %p614_p6 = por %p152_p4, %p151_p3 }
   0xa   : > { %p410_p7 = scmp.ge.s32.totalorder %s536_s21, 1  ;;  %p189_p8 = scmp.lt.s32.totalorder %s536_s21, 3 }
   0xc   : > { %p190_p9 = pnand %p410_p7, %p189_p8 }
   0xd   : > { %p216_p10 = scmp.lt.s32.totalorder (!%p190_p9), %s593_s22, 1  ;;  %s213_s10 = sand.u32 (!%p190_p9), 1, %s528_s19  }
   0xe   : > { %193 = sbr.rel (%p190_p9) target bundleno = 335 (0x14f), region = 40  ;;  %s419_s13 = sshll.u32 (!%p190_p9), %s593_s22, 3 }
   0xf   : > { %s341_s16 = scalar_lea.hbm (!%p190_p9), %s690_s5, %s419_s13  ;;  %s331_s25 = scalar_lea.sflag (!%p190_p9), [#allocation3], %s213_s10 }
  0x10   : > { %s344_s23 = sshll.u32 (!%p190_p9), %s341_s16, 4  ;;  %s345_s23 = int_to_ptr.hbm [resolvable:$true] %s344_s23 }
  0x11   : > { %s488_s26 = sshra.s32 (!%p190_p9), %s345_s23, 4  ;;  %s489_s26 = int_to_ptr.hbm [resolvable:$true] %s488_s26 }
  0x12   : > { %p495_p0 = scmp.lt.s32.totalorder (!%p190_p9), %s489_s26, %s690_s5 }
  0x13   : > { %v224_v0 = vld [vmem:[%s687_s2 + $0x8] sm:$0xff]  ;;  %v538_v1 = vmov 0   ;;  %s217_s7 = scalar_select %p216_p10, %s593_s22, 1  ;;  %v221_v2 = vld [vmem:[%s686_s1] sm:$0xff]  ;;  %vm235_vm0 = vcmask 64512   ;;  %vm283_vm1 = vcmask 130048  }
  0x14   : > { %468 = vset.pattern.permute.xlu0 %v538_v1  ;;  %469 = vset.pattern.permute.xlu1 %v538_v1  ;;  %v222_v3 = vld [vmem:[%s686_s1 + $0x8] sm:$0xff]  ;;  %v223_v5 = vld [vmem:[%s687_s2] sm:$0xff]  ;;  %s490_s22 = scalar_lea.hbm %s489_s26, 16 }
  0x15   : > { %232 = vperm.xlu0 %468, %v224_v0   ;;  %s412_s8 = sshll.u32 %s217_s7, 3  ;;  %v272_v6 = vld [vmem:[%s689_s4 + $0x8] sm:$0xff]  ;;  %v271_v7 = vld [vmem:[%s689_s4] sm:$0xff]  ;;  %p491_p11 = scmp.ne.s32.totalorder %s489_s26, %s490_s22 }
  0x16   : > { %s219_s11 = scalar_lea.vmem %s685_s0, %s412_s8  ;;  %280 = vperm.xlu1 %469, %v272_v6   ;;  %v270_v18 = vld [vmem:[%s688_s3 + $0x8] sm:$0xff]  ;;  %v269_v19 = vld [vmem:[%s688_s3] sm:$0xff]  ;;  %s494_s7 = scalar_lea.hbm %s690_s5, 32 }
  0x17   : > { %v220_v4 = vld [vmem:[%s219_s11] sm:$0xff]  ;;  %s411_s11 = sshll.u32 %s213_s10, 4  ;;  %p492_p12 = pnand %p491_p11, %p610_p5 }
  0x18   : > { %257 = vmatpush.msra.mxu0 %v220_v4  ;;  %422 = vmatpush.msra.mxu3 %v220_v4  ;;  %s215_s12 = scalar_lea.vmem [#allocation2], %s411_s11  ;;  %p496_p1 = scmp.lt.s32.totalorder %s494_s7, %s490_s22 }
  0x19   : > { %413 = vmatmul.msk.f32.vlgmr.msra.gmra.mxu0 %vm235_vm0, %v221_v2  ;;  %414 = vmatmul.msk.f32.vlgmr.msra.gmra.mxu3 %vm235_vm0, %v222_v3  ;;  %s342_s17 = sshll.u32 %s215_s12, 4  ;;  %p493_p13 = pneg %p492_p12  ;;  %s343_s17 = int_to_ptr.vmem [resolvable:$true] %s342_s17 }
  0x1a   : > { %p497_p2 = por %p496_p1, %p495_p0 }
  0x1c   : > { %p498_p3 = pnand %p497_p2, %p493_p13 }
  0x1d   : > { %227 = vperm.xlu0 %468, %v223_v5  }
  0x1e   : > { %275 = vperm.xlu1 %469, %v271_v7  }
  0x87   : > { %v233_v8 = vpop.permute.xlu0 %232 }
  0x88   : > { %v281_v20 = vpop.permute.xlu1 %280 }
  0x8f   : > { %v228_v9 = vpop.permute.xlu0 %227 }
  0x90   : > { %v276_v21 = vpop.permute.xlu1 %275 }
  0x96   : > { %v259_v10 = vpop.f32.mrf.mxu0 }
  0x97   : > { %v260_v11 = vadd.f32 %v259_v10, %v228_v9 }
  0x99   : > { %v265_v14 = vmul.f32 0.01, %v260_v11 }
  0x9b   : > { %v267_v17 = vmax.f32 %v260_v11, %v265_v14 }
  0x9c   : > { %v262_v12 = vpop.f32.mrf.mxu3 }
  0x9d   : > { %v263_v13 = vadd.f32 %v262_v12, %v233_v8 }
  0x9f   : > { %v266_v15 = vmul.f32 0.01, %v263_v13 }
  0xa1   : > { %v268_v16 = vmax.f32 %v263_v13, %v266_v15 }
  0xa3   : > { %304 = vmatpush.msra.mxu1 %v268_v16  ;;  %423 = vmatpush.msra.mxu2 %v268_v16 }
  0xa5   : > { %305 = vmatpush.msra.mxu1 %v267_v17  ;;  %424 = vmatpush.msra.mxu2 %v267_v17 }
  0xa6   : > { %416 = vmatmul.msk.f32.vlgmr.msra.gmra.mxu2 %vm283_vm1, %v270_v18  ;;  %415 = vmatmul.msk.f32.vlgmr.msra.gmra.mxu1 %vm283_vm1, %v269_v19 }
 0x123   : > { %v307_v22 = vpop.f32.mrf.mxu1 }
 0x124   : > { %v308_v23 = vadd.f32 %v307_v22, %v276_v21 }
 0x126   : > { %v313_v24 = vmul.f32 0.01, %v308_v23 }
 0x128   : > { %v314_v25 = vadd.f32 %v313_v24, %v220_v4 }
 0x129   : > { %v310_v26 = vpop.f32.mrf.mxu2 }
 0x12a   : > { %v417_v27 = vclamps-f32 %v314_v25, 2.0  ;;  %v311_v28 = vadd.f32 %v310_v26, %v281_v20 }
 0x12c   : > { %328 = vst [vmem:[%s215_s12] sm:$0xff] %v417_v27  ;;  %v318_v29 = vand.u32 2147483647, %v311_v28  ;;  %v317_v35 = vmax.f32 %v311_v28, 0.0 }
 0x12e   : > { %v319_v30 = vsub.f32 0.0, %v318_v29 }
 0x130   : > { %v320_v31 = vmul.f32 1.442695, %v319_v30 }
 0x132   : > { %470 = vpow2.f32 %v320_v31 }
 0x138   : > { %v471_v32 = vpop.eup %470 }
 0x139   : > { %v322_v33 = vadd.f32 1.0, %v471_v32 }
 0x13b   : > { %472 = vlog2.f32 %v322_v33 }
 0x141   : > { %v473_v34 = vpop.eup %472 }
 0x142   : > { %v324_v36 = vmul.f32 0.6931472, %v473_v34 }
 0x144   : > { %v325_v37 = vadd.f32 %v324_v36, %v317_v35 }
 0x146   : > { %v326_v38 = vmax.f32 %v325_v37, 1e-10 }
 0x148   : > { %v327_v39 = vmin.f32 %v326_v38, 1.0 }
 0x14a   : > { %329 = vst [vmem:[%s215_s12 + $0x8] sm:$0xff] %v327_v39 }
 0x14b   : > { %501 = shalt.err (!%p498_p3)
}
 0x14c   : > { %s539_s10 = smov 128   ;;  %s540_s11 = smov 256  }
 0x14d   : > { %s541_s12 = smov 8  }
 0x14e   : > { %425 = dma.vmem_to_hbm [thread:$0]  (%p610_p5), %s343_s17, 256, %s345_s23, %s331_s25, %s539_s10, %s540_s11, %s541_s12  }
 0x14f PF: > { %p431_p4 = scmp.ge.s32.totalorder %s536_s21, 2  ;;  %s359_s13 = sand.u32 1, %s524_s18  }
 0x150   : > { %s360_s14 = scalar_lea.sflag [#allocation3], %s359_s13 }
 0x151   : > { %p428_p7 = pnand %p431_p4, %p614_p6 }
 0x153   : > { %p429_p8 = pneg %p428_p7 }
 0x155   : > { %519 = dma.done.wait (%p429_p8), %s360_s14, 256  }
 0x156   : > { %521 = vsyncadd (%p429_p8), %s360_s14, 4294967040  ;;  %p15_p9 = scmp.ge.s32.totalorder %s597_s24, 4   ;;  %s693_s18 = smov %s528_s19 }
 0x157   : > { %s694_s19 = smov %s532_s20  ;;  %s695_s20 = smov %s608_s27 }
 0x158   : > { %s696_s21 = smov %s597_s24  ;;  %17 = sbr.rel (!%p15_p9) target bundleno = 3 (0x3), region = 75 }
 0x15d   :  { %366 = vsyncpa [#allocation3], 1 }
 0x15e   :  { %368 = vsyncpa [#allocation3 + $0x1], 1 }

</bundles_post_ra>
